<compile_context>
chip_gen: v5e
topology: v5e:2x2
jax: 0.10.0
libtpu: 0.0.40
codegen_flags: <defaults>
</compile_context>

<pallas_src>
import functools

import jax
import jax.numpy as jnp
from jax import lax
from jax.experimental import pallas as pl
from jax.experimental.pallas import tpu as pltpu


def _round_up(x, m):
    return ((x + m - 1) // m) * m


# ----------------------------- fused kernel -------------------------------- #

def textcnn_fused_kernel(x_ref, w_ref, b_ref, fcw_ref, fcb_ref,
                         out_ref, hid_ref, *,
                         filter_sizes, num_filters, seq_len):
    """One grid step = one batch tile.

    x_ref  : (TB, L + kmax - 1, H)  bf16, zero-padded along L
    w_ref  : (kmax*H, n*F)          bf16, bank im2col weights (rows >= k*H are 0)
    b_ref  : (1, n*F)               f32, bank-concatenated conv biases
    fcw_ref: (n*F, C_pad)           bf16, lane-padded FC weight
    fcb_ref: (1, C_pad)             f32
    out_ref: (TB, C_pad)            f32 logits (lane-dense slab)
    hid_ref: (TB, n*F)              f32 pooled features (pre-dropout hidden_state)
    """
    kmax = max(filter_sizes)
    n = len(filter_sizes)
    F = num_filters
    L = seq_len
    T = L                                    # = L_pad - kmax + 1 pooling positions

    x = x_ref[...]                           # (TB, L_pad, H), read once
    TB, _, H = x.shape

    # Single im2col covering all banks: K = kmax*H (= 128 for H = 32).
    patches = jnp.concatenate([x[:, j:j + T, :] for j in range(kmax)], axis=-1)
    # One 2-D MXU contraction: M = TB*T rows, N = n*F lane-dense columns.
    conv = jnp.dot(patches.reshape(TB * T, kmax * H), w_ref[...],
                   preferred_element_type=jnp.float32)          # (TB*T, n*F)
    conv = conv.reshape(TB, T, n * F)

    # Bank k only has L-k+1 valid time positions; later positions touch the
    # zero padding, so add a -inf mask before the max-pool.
    t_iota = lax.broadcasted_iota(jnp.int32, (T, F), 0)
    neg_mask = jnp.concatenate(
        [jnp.where(t_iota < (L - k + 1), 0.0, -jnp.inf) for k in filter_sizes],
        axis=-1)                                                # (T, n*F) f32
    pooled = jnp.max(conv + neg_mask[None], axis=1)             # (TB, n*F)

    # max_t relu(s_t + b) == relu(max_t s_t + b): bias + ReLU after the pool.
    hidden = jnp.maximum(pooled + b_ref[...], 0.0)              # (TB, n*F) f32
    hid_ref[...] = hidden                                       # single full store

    # Dropout = eval-mode identity.  FC consumes the register-resident hidden
    # (no hid_ref reload).
    out_ref[...] = (jnp.dot(hidden.astype(fcw_ref.dtype), fcw_ref[...],
                            preferred_element_type=jnp.float32)
                    + fcb_ref[...])


# ------------------------------- wrapper ----------------------------------- #

def textcnn_forward(x, params, *, filter_sizes=(2, 3, 4), block_b=None):
    """Returns (logits, hidden_state), matching the PyTorch module forward."""
    x = x.astype(jnp.float32)
    B, L, H = x.shape
    n = len(filter_sizes)
    kmax = max(filter_sizes)
    F = params["convs"][0][0].shape[-1]
    C = params["fc_w"].shape[-1]
    C_pad = _round_up(C, 128)            # lane-dense logits slab, sliced below

    # ---- pack all banks into one (kmax*H, n*F) weight slab (bf16) ----------
    w_banks, b_banks = [], []
    for k, (w, b) in zip(filter_sizes, params["convs"]):
        w_banks.append(jnp.pad(w, ((0, (kmax - k) * H), (0, 0))))
        b_banks.append(b)
    w_all = jnp.concatenate(w_banks, axis=-1).astype(jnp.bfloat16)   # (kmax*H, n*F)
    b_all = jnp.concatenate(b_banks, axis=-1).astype(jnp.float32)    # (1, n*F)
    fc_w = jnp.pad(params["fc_w"], ((0, 0), (0, C_pad - C))).astype(jnp.bfloat16)
    fc_b = jnp.pad(params["fc_b"], ((0, 0), (0, C_pad - C))).astype(jnp.float32)

    # ---- batch tiling -------------------------------------------------------
    if block_b is None:
        # Tiny at test shapes; when B/L/H scale, cap so 2x bf16 x-tile +
        # ~600 KiB resident weights + the (block_b*L, n*F) f32 conv
        # intermediate stay well under the 32 MiB scoped VMEM budget
        # (v7x physical VMEM is only 64 MiB).
        block_b = min(B, 128)
    grid_b = pl.cdiv(B, block_b)
    B_pad = grid_b * block_b
    L_pad = L + kmax - 1
    # Zero-pad batch (tiled out) and seq (so one k=kmax im2col covers all banks).
    x_pad = jnp.pad(x, ((0, B_pad - B), (0, kmax - 1), (0, 0))).astype(jnp.bfloat16)

    kernel = functools.partial(textcnn_fused_kernel,
                               filter_sizes=tuple(filter_sizes),
                               num_filters=F, seq_len=L)

    in_specs = [
        pl.BlockSpec((block_b, L_pad, H), lambda i: (i, 0, 0)),      # x batch tile
        # Constant block indices: weights stay VMEM-resident across grid steps
        # (not re-DMA'd per batch tile).
        pl.BlockSpec(w_all.shape, lambda i: (0, 0)),
        pl.BlockSpec(b_all.shape, lambda i: (0, 0)),
        pl.BlockSpec(fc_w.shape, lambda i: (0, 0)),
        pl.BlockSpec(fc_b.shape, lambda i: (0, 0)),
    ]
    out_shape = (jax.ShapeDtypeStruct((B_pad, C_pad), jnp.float32),
                 jax.ShapeDtypeStruct((B_pad, n * F), jnp.float32))
    out_specs = (pl.BlockSpec((block_b, C_pad), lambda i: (i, 0)),
                 pl.BlockSpec((block_b, n * F), lambda i: (i, 0)))

    logits_pad, hidden_pad = pl.pallas_call(
        kernel,
        out_shape=out_shape,
        grid=(grid_b,),
        in_specs=in_specs,
        out_specs=out_specs,
        compiler_params=pltpu.CompilerParams(
            dimension_semantics=("parallel",),    # batch tiles -> 2nd TC on v7x
            vmem_limit_bytes=32 << 20),           # explicit (v5e default is 16 MiB)
    )(x_pad, w_all, b_all, fc_w, fc_b)

    return logits_pad[:B, :C], hidden_pad[:B]


# ------------------------- parameter construction -------------------------- #

def torch_conv_weight_to_im2col(w_torch):
    """torch Conv2d(1,F,(k,H)).weight (F,1,k,H) -> im2col layout (k*H, F)."""
    F, _, k, H = w_torch.shape
    return jnp.transpose(w_torch[:, 0], (1, 2, 0)).reshape(k * H, F)


def init_params(key, hidden_size, num_filters, filter_sizes, num_classes):
    params = {"convs": []}
    keys = jax.random.split(key, 2 * len(filter_sizes) + 2)
    for i, k in enumerate(filter_sizes):
        w = jax.random.normal(keys[2 * i], (k * hidden_size, num_filters),
                              jnp.float32) * 0.02
        b = jax.random.normal(keys[2 * i + 1], (1, num_filters),
                              jnp.float32) * 0.02
        params["convs"].append((w, b))
    d = num_filters * len(filter_sizes)
    params["fc_w"] = jax.random.normal(keys[-2], (d, num_classes),
                                       jnp.float32) * 0.02
    params["fc_b"] = jax.random.normal(keys[-1], (1, num_classes),
                                       jnp.float32) * 0.02
    return params


# ------------------------- pure-JAX reference check ------------------------ #

def textcnn_reference(x, params, filter_sizes=(2, 3, 4)):
    """Mirrors the torch ordering (ReLU before max-pool), all-f32."""
    x = x.astype(jnp.float32)
    B, L, H = x.shape
    feats = []
    for k, (w, b) in zip(filter_sizes, params["convs"]):
        lout = L - k + 1
        patches = jnp.concatenate(
            [x[:, j:j + lout, :] for j in range(k)], axis=-1)
        conv = jnp.einsum('btp,pf->btf', patches, w)
        act = jax.nn.relu(conv + b[None])          # (B, lout, F)
        feats.append(jnp.max(act, axis=1))         # (B, F)
    hidden = jnp.concatenate(feats, axis=1)
    logits = hidden @ params["fc_w"] + params["fc_b"]
    return logits, hidden


# --------------------------------- main ------------------------------------ #

if __name__ == "__main__":
    B, L, H = 2, 8, 32          # batch, seq_len, hidden_size
    NUM_FILTERS = 256
    FILTER_SIZES = (2, 3, 4)
    NUM_CLASSES = 4

    key = jax.random.PRNGKey(0)
    kx, kp = jax.random.split(key)
    x = jax.random.normal(kx, (B, L, H), jnp.float32)
    params = init_params(kp, H, NUM_FILTERS, FILTER_SIZES, NUM_CLASSES)

    fwd = jax.jit(functools.partial(textcnn_forward,
                                    filter_sizes=FILTER_SIZES))
    logits, hidden_state = fwd(x, params)
    jax.block_until_ready((logits, hidden_state))

    assert logits.shape == (B, NUM_CLASSES)
    assert hidden_state.shape == (B, NUM_FILTERS * len(FILTER_SIZES))

    ref_logits, ref_hidden = textcnn_reference(x, params, FILTER_SIZES)
    # bf16 MXU operands vs an all-f32 reference: tolerance relaxed to 2e-2.
    assert jnp.allclose(hidden_state, ref_hidden, atol=2e-2, rtol=2e-2)
    assert jnp.allclose(logits, ref_logits, atol=2e-2, rtol=2e-2)

    print("KERNEL_OK")
</pallas_src>

<mosaic_0001>
module attributes {stable_mosaic.version = 11 : i64} {
  func.func @textcnn_fused_kernel(%arg0: i32, %arg1: memref<2x11x32xbf16, #tpu.memory_space<vmem>>, %arg2: memref<128x768xbf16, #tpu.memory_space<vmem>>, %arg3: memref<1x768xf32, #tpu.memory_space<vmem>>, %arg4: memref<768x128xbf16, #tpu.memory_space<vmem>>, %arg5: memref<1x128xf32, #tpu.memory_space<vmem>>, %arg6: memref<2x128xf32, #tpu.memory_space<vmem>>, %arg7: memref<2x768xf32, #tpu.memory_space<vmem>>) attributes {dimension_semantics = [#tpu.dimension_semantics<parallel>], iteration_bounds = array<i64: 1>, scalar_prefetch = 0 : i64, scratch_operands = 0 : i64, tpu.core_type = #tpu.core_type<tc>, window_params = [{transform_indices = @transform_0, window_bounds = array<i64: 2, 11, 32>}, {pipeline_mode = #tpu.pipeline_mode<synchronous>, transform_indices = @transform_1, window_bounds = array<i64: 128, 768>}, {pipeline_mode = #tpu.pipeline_mode<synchronous>, transform_indices = @transform_2, window_bounds = array<i64: 1, 768>}, {pipeline_mode = #tpu.pipeline_mode<synchronous>, transform_indices = @transform_3, window_bounds = array<i64: 768, 128>}, {pipeline_mode = #tpu.pipeline_mode<synchronous>, transform_indices = @transform_4, window_bounds = array<i64: 1, 128>}, {transform_indices = @transform_5, window_bounds = array<i64: 2, 128>}, {transform_indices = @transform_6, window_bounds = array<i64: 2, 768>}]} {
    %c0 = arith.constant 0 : index
    %c0_0 = arith.constant 0 : index
    %c0_1 = arith.constant 0 : index
    %0 = vector.load %arg1[%c0, %c0_0, %c0_1] : memref<2x11x32xbf16, #tpu.memory_space<vmem>>, vector<2x11x32xbf16>
    %1 = vector.extract_strided_slice %0 {offsets = [0, 0, 0], sizes = [2, 8, 32], strides = [1, 1, 1]} : vector<2x11x32xbf16> to vector<2x8x32xbf16>
    %2 = vector.extract_strided_slice %0 {offsets = [0, 1, 0], sizes = [2, 8, 32], strides = [1, 1, 1]} : vector<2x11x32xbf16> to vector<2x8x32xbf16>
    %3 = vector.extract_strided_slice %0 {offsets = [0, 2, 0], sizes = [2, 8, 32], strides = [1, 1, 1]} : vector<2x11x32xbf16> to vector<2x8x32xbf16>
    %4 = vector.extract_strided_slice %0 {offsets = [0, 3, 0], sizes = [2, 8, 32], strides = [1, 1, 1]} : vector<2x11x32xbf16> to vector<2x8x32xbf16>
    %5 = tpu.concatenate %1, %2, %3, %4 in 2 : vector<2x8x32xbf16>, vector<2x8x32xbf16>, vector<2x8x32xbf16>, vector<2x8x32xbf16> -> vector<2x8x128xbf16>
    %6 = vector.shape_cast %5 : vector<2x8x128xbf16> to vector<16x128xbf16>
    %c0_2 = arith.constant 0 : index
    %c0_3 = arith.constant 0 : index
    %7 = vector.load %arg2[%c0_2, %c0_3] : memref<128x768xbf16, #tpu.memory_space<vmem>>, vector<128x768xbf16>
    %cst = arith.constant dense<0.000000e+00> : vector<16x768xf32>
    %8 = tpu.matmul %6, %7, %cst {dimension_numbers = #tpu.dot_dimension_numbers<[1], [0], [0], [1], [0, 0, 1, 1], [], []>} : vector<16x128xbf16>, vector<128x768xbf16>, vector<16x768xf32> -> vector<16x768xf32>
    %9 = vector.shape_cast %8 : vector<16x768xf32> to vector<2x8x768xf32>
    %10 = tpu.iota {dimensions = array<i32: 0>} : vector<8x256xi32>
    %c7_i32 = arith.constant 7 : i32
    %11 = vector.broadcast %c7_i32 : i32 to vector<8x256xi32>
    %12 = arith.cmpi slt, %10, %11 : vector<8x256xi32>
    %cst_4 = arith.constant 0.000000e+00 : f32
    %cst_5 = arith.constant 0xFF800000 : f32
    %13 = vector.broadcast %cst_4 : f32 to vector<8x256xf32>
    %14 = vector.broadcast %cst_5 : f32 to vector<8x256xf32>
    %15 = arith.select %12, %13, %14 : vector<8x256xi1>, vector<8x256xf32>
    %c6_i32 = arith.constant 6 : i32
    %16 = vector.broadcast %c6_i32 : i32 to vector<8x256xi32>
    %17 = arith.cmpi slt, %10, %16 : vector<8x256xi32>
    %cst_6 = arith.constant 0.000000e+00 : f32
    %cst_7 = arith.constant 0xFF800000 : f32
    %18 = vector.broadcast %cst_6 : f32 to vector<8x256xf32>
    %19 = vector.broadcast %cst_7 : f32 to vector<8x256xf32>
    %20 = arith.select %17, %18, %19 : vector<8x256xi1>, vector<8x256xf32>
    %c5_i32 = arith.constant 5 : i32
    %21 = vector.broadcast %c5_i32 : i32 to vector<8x256xi32>
    %22 = arith.cmpi slt, %10, %21 : vector<8x256xi32>
    %cst_8 = arith.constant 0.000000e+00 : f32
    %cst_9 = arith.constant 0xFF800000 : f32
    %23 = vector.broadcast %cst_8 : f32 to vector<8x256xf32>
    %24 = vector.broadcast %cst_9 : f32 to vector<8x256xf32>
    %25 = arith.select %22, %23, %24 : vector<8x256xi1>, vector<8x256xf32>
    %26 = tpu.concatenate %15, %20, %25 in 1 : vector<8x256xf32>, vector<8x256xf32>, vector<8x256xf32> -> vector<8x768xf32>
    %27 = vector.shape_cast %26 : vector<8x768xf32> to vector<1x8x768xf32>
    %28 = vector.broadcast %27 : vector<1x8x768xf32> to vector<2x8x768xf32>
    %29 = arith.addf %9, %28 : vector<2x8x768xf32>
    %cst_10 = arith.constant dense<0xFF800000> : vector<2x768xf32>
    %30 = vector.multi_reduction <maximumf>, %29, %cst_10 [1] : vector<2x8x768xf32> to vector<2x768xf32>
    %c0_11 = arith.constant 0 : index
    %c0_12 = arith.constant 0 : index
    %31 = vector.load %arg3[%c0_11, %c0_12] : memref<1x768xf32, #tpu.memory_space<vmem>>, vector<1x768xf32>
    %32 = vector.broadcast %31 : vector<1x768xf32> to vector<2x768xf32>
    %33 = arith.addf %30, %32 : vector<2x768xf32>
    %cst_13 = arith.constant 0.000000e+00 : f32
    %34 = vector.broadcast %cst_13 : f32 to vector<2x768xf32>
    %35 = arith.maximumf %33, %34 : vector<2x768xf32>
    %c0_14 = arith.constant 0 : index
    %c0_15 = arith.constant 0 : index
    %36 = vector.load %arg7[%c0_14, %c0_15] : memref<2x768xf32, #tpu.memory_space<vmem>>, vector<2x768xf32>
    tpu.vector_store %arg7[%c0_14, %c0_15], %35 {strides = array<i32>} : memref<2x768xf32, #tpu.memory_space<vmem>>, vector<2x768xf32>,
    %37 = arith.truncf %35 : vector<2x768xf32> to vector<2x768xbf16>
    %c0_16 = arith.constant 0 : index
    %c0_17 = arith.constant 0 : index
    %38 = vector.load %arg4[%c0_16, %c0_17] : memref<768x128xbf16, #tpu.memory_space<vmem>>, vector<768x128xbf16>
    %cst_18 = arith.constant dense<0.000000e+00> : vector<2x128xf32>
    %39 = tpu.matmul %37, %38, %cst_18 {dimension_numbers = #tpu.dot_dimension_numbers<[1], [0], [0], [1], [0, 0, 1, 1], [], []>} : vector<2x768xbf16>, vector<768x128xbf16>, vector<2x128xf32> -> vector<2x128xf32>
    %c0_19 = arith.constant 0 : index
    %c0_20 = arith.constant 0 : index
    %40 = vector.load %arg5[%c0_19, %c0_20] : memref<1x128xf32, #tpu.memory_space<vmem>>, vector<1x128xf32>
    %41 = vector.broadcast %40 : vector<1x128xf32> to vector<2x128xf32>
    %42 = arith.addf %39, %41 : vector<2x128xf32>
    %c0_21 = arith.constant 0 : index
    %c0_22 = arith.constant 0 : index
    %43 = vector.load %arg6[%c0_21, %c0_22] : memref<2x128xf32, #tpu.memory_space<vmem>>, vector<2x128xf32>
    tpu.vector_store %arg6[%c0_21, %c0_22], %42 {strides = array<i32>} : memref<2x128xf32, #tpu.memory_space<vmem>>, vector<2x128xf32>,
    return
  }
  func.func @transform_0(%arg0: i32) -> (i32, i32, i32) {
    %c0_i32 = arith.constant 0 : i32
    %c0_i32_0 = arith.constant 0 : i32
    %c0_i32_1 = arith.constant 0 : i32
    return %arg0, %c0_i32, %c0_i32_0 : i32, i32, i32
  }
  func.func @transform_1(%arg0: i32) -> (i32, i32) {
    %c0_i32 = arith.constant 0 : i32
    %c0_i32_0 = arith.constant 0 : i32
    %c0_i32_1 = arith.constant 0 : i32
    return %c0_i32, %c0_i32_0 : i32, i32
  }
  func.func @transform_2(%arg0: i32) -> (i32, i32) {
    %c0_i32 = arith.constant 0 : i32
    %c0_i32_0 = arith.constant 0 : i32
    %c0_i32_1 = arith.constant 0 : i32
    return %c0_i32, %c0_i32_0 : i32, i32
  }
  func.func @transform_3(%arg0: i32) -> (i32, i32) {
    %c0_i32 = arith.constant 0 : i32
    %c0_i32_0 = arith.constant 0 : i32
    %c0_i32_1 = arith.constant 0 : i32
    return %c0_i32, %c0_i32_0 : i32, i32
  }
  func.func @transform_4(%arg0: i32) -> (i32, i32) {
    %c0_i32 = arith.constant 0 : i32
    %c0_i32_0 = arith.constant 0 : i32
    %c0_i32_1 = arith.constant 0 : i32
    return %c0_i32, %c0_i32_0 : i32, i32
  }
  func.func @transform_5(%arg0: i32) -> (i32, i32) {
    %c0_i32 = arith.constant 0 : i32
    %c0_i32_0 = arith.constant 0 : i32
    return %arg0, %c0_i32 : i32, i32
  }
  func.func @transform_6(%arg0: i32) -> (i32, i32) {
    %c0_i32 = arith.constant 0 : i32
    %c0_i32_0 = arith.constant 0 : i32
    return %arg0, %c0_i32 : i32, i32
  }
}

</mosaic_0001>

<bundles_post_ra>
// kernel: textcnn_forward.1
= control target key start
LH: loop header
LB: loop body
LE: loop exit
PB: predicated region body
PF: predicated region fallthrough
CT: control target
= control target key end

     0   :  { %12 = vsyncpa [#allocation3], 0  ;;  %s1760_s15 = smov 64   ;;  %s1761_s30 = smov 32   ;;  %s2367_s0 = inlined_call_operand.vmem [shape: bf16[2,11,32], index: 0, kind: input, shape index: {}]   ;;  %s2368_s1 = inlined_call_operand.vmem [shape: bf16[128,768], index: 1, kind: input, shape index: {}]   ;;  %s2369_s2 = inlined_call_operand.vmem [shape: f32[1,768], index: 2, kind: input, shape index: {}]   ;;  %s2370_s3 = inlined_call_operand.vmem [shape: bf16[768,128], index: 3, kind: input, shape index: {}]   ;;  %s2371_s4 = inlined_call_operand.vmem [shape: f32[1,128], index: 4, kind: input, shape index: {}]   ;;  %s2372_s5 = inlined_call_operand.hbm [shape: f32[2,128], index: 5, kind: output, shape index: {0}]   ;;  %s2373_s6 = inlined_call_operand.hbm [shape: f32[2,768], index: 6, kind: output, shape index: {1}]  }
   0x1   :  { %v1213_v0 = vld [vmem:[%s2367_s0] sm:$0xf]  ;;  %v1603_v1 = vld [vmem:[%s2367_s0] sm:$0x30]  ;;  %v1217_v3 = vld [vmem:[%s2367_s0 + $0x8] sm:$0xf] }
   0x2   :  { %v1214_v2 = vor.u32 %v1603_v1, %v1213_v0  ;;  %v1604_v4 = vld [vmem:[%s2367_s0 + $0x8] sm:$0x30]  ;;  %v1389_v6 = vld [vmem:[%s2368_s1 + $0x150] sm:$0xf]  ;;  %v1650_v7 = vld [vmem:[%s2368_s1 + $0x164] sm:$0xf0] }
   0x3   :  { %v1218_v5 = vor.u32 %v1604_v4, %v1217_v3  ;;  %v1647_v8 = vld [vmem:[%s2368_s1 + $0x154] sm:$0xf]  ;;  %v1390_v12 = vor.u32 %v1650_v7, %v1389_v6  ;;  %v1391_v13 = vld [vmem:[%s2368_s1 + $0x168] sm:$0xf0]  ;;  %v1365_v16 = vld [vmem:[%s2368_s1 + $0x120] sm:$0xf] }
   0x4   :  { %v39_v9 = vshrl.u32 %v1214_v2, 16  ;;  %v41_v10 = vshll.u32 %v1214_v2, 16  ;;  %v56_v11 = vrot.slane %v1214_v2, 1  ;;  %v1394_v15 = vor.u32 %v1647_v8, %v1391_v13  ;;  %v1644_v20 = vld [vmem:[%s2368_s1 + $0x134] sm:$0xf0]  ;;  %s1762_s7 = smov 96  }
   0x5   :  { %v48_v14 = vshll.u32 %v1218_v5, 16  ;;  %383 = vmatpush.bf16.msra.mxu0 %v1390_v12  ;;  %v46_v21 = vshrl.u32 %v1218_v5, 16  ;;  %v1366_v22 = vor.u32 %v1644_v20, %v1365_v16  ;;  %v1641_v23 = vld [vmem:[%s2368_s1 + $0x124] sm:$0xf]  ;;  %v1367_v26 = vld [vmem:[%s2368_s1 + $0x138] sm:$0xf0] }
   0x6   :  { %v43_v17 = vrot.slane %v41_v10, 1  ;;  %58 = vrot.lane.b32.xlu1 %v56_v11, %s1760_s15  ;;  %v62_v18 = vrot.slane %v39_v9, 1  ;;  %v63_v19 = vrot.slane %v41_v10, 2  ;;  %397 = vmatpush.bf16.msra.mxu1 %v1394_v15  ;;  %v1341_v27 = vld [vmem:[%s2368_s1 + $0xf0] sm:$0xf]  ;;  %v57_v30 = vrot.slane %v1218_v5, 1 }
   0x7   :  { %v1638_v28 = vld [vmem:[%s2368_s1 + $0x104] sm:$0xf0]  ;;  %v50_v29 = vrot.slane %v48_v14, 1  ;;  %v1370_v31 = vor.u32 %v1641_v23, %v1367_v26  ;;  %v1635_v32 = vld [vmem:[%s2368_s1 + $0xf4] sm:$0xf]  ;;  %v65_v34 = vrot.slane %v46_v21, 1 }
   0x8   :  { %v44_v24 = vor.u32 %v43_v17, %v39_v9  ;;  %v64_v25 = vor.u32 %v63_v19, %v62_v18  ;;  %v1343_v33 = vld [vmem:[%s2368_s1 + $0x108] sm:$0xf0]  ;;  %v66_v35 = vrot.slane %v48_v14, 2  ;;  %v1317_v36 = vld [vmem:[%s2368_s1 + $0xc0] sm:$0xf]  ;;  %v1342_v38 = vor.u32 %v1638_v28, %v1341_v27 }
   0x9   :  { %v1632_v37 = vld [vmem:[%s2368_s1 + $0xd4] sm:$0xf0]  ;;  %384 = vmatpush.bf16.msra.mxu0 %v1366_v22  ;;  %v1346_v39 = vor.u32 %v1635_v32, %v1343_v33  ;;  %v1629_v40 = vld [vmem:[%s2368_s1 + $0xc4] sm:$0xf]  ;;  %v1651_v42 = vld [vmem:[%s2368_s1 + $0x16c] sm:$0xf0]  ;;  %v51_v48 = vor.u32 %v50_v29, %v46_v21 }
   0xa   :  { %52 = vrot.lane.b32.xlu0 %v44_v24, %s1761_s30  ;;  %68 = vrot.lane.b32.xlu2 %v64_v25, %s1762_s7  ;;  %v1397_v41 = vld [vmem:[%s2368_s1 + $0x158] sm:$0xf]  ;;  %v1319_v43 = vld [vmem:[%s2368_s1 + $0xd8] sm:$0xf0]  ;;  %v67_v49 = vor.u32 %v66_v35, %v65_v34  ;;  %v1318_v53 = vor.u32 %v1632_v37, %v1317_v36 }
   0xb   :  { %398 = vmatpush.bf16.msra.mxu1 %v1370_v31  ;;  %v1398_v44 = vor.u32 %v1651_v42, %v1397_v41  ;;  %v1648_v45 = vld [vmem:[%s2368_s1 + $0x15c] sm:$0xf]  ;;  %v1399_v46 = vld [vmem:[%s2368_s1 + $0x170] sm:$0xf0]  ;;  %v1373_v50 = vld [vmem:[%s2368_s1 + $0x128] sm:$0xf]  ;;  %v1322_v54 = vor.u32 %v1629_v40, %v1319_v43 }
   0xc   :  { %v1402_v47 = vor.u32 %v1648_v45, %v1399_v46  ;;  %v1645_v51 = vld [vmem:[%s2368_s1 + $0x13c] sm:$0xf0]  ;;  %v1642_v52 = vld [vmem:[%s2368_s1 + $0x12c] sm:$0xf]  ;;  %v1293_v55 = vld [vmem:[%s2368_s1 + $0x90] sm:$0xf] }
   0xd   :  { %411 = vmatpush.bf16.msra.mxu2 %v1398_v44  ;;  %385 = vmatpush.bf16.msra.mxu0 %v1342_v38  ;;  %v1626_v56 = vld [vmem:[%s2368_s1 + $0xa4] sm:$0xf0]  ;;  %v1375_v57 = vld [vmem:[%s2368_s1 + $0x140] sm:$0xf0]  ;;  %v1623_v58 = vld [vmem:[%s2368_s1 + $0x94] sm:$0xf]  ;;  %v1374_v60 = vor.u32 %v1645_v51, %v1373_v50 }
   0xe   :  { %60 = vrot.lane.b32.xlu1 %v57_v30, %s1760_s15  ;;  %425 = vmatpush.bf16.msra.mxu3 %v1402_v47  ;;  %v1295_v59 = vld [vmem:[%s2368_s1 + $0xa8] sm:$0xf0]  ;;  %v1378_v61 = vor.u32 %v1642_v52, %v1375_v57  ;;  %v1349_v62 = vld [vmem:[%s2368_s1 + $0xf8] sm:$0xf]  ;;  %v1639_v63 = vld [vmem:[%s2368_s1 + $0x10c] sm:$0xf0]  ;;  %v1294_v2 = vor.u32 %v1626_v56, %v1293_v55 }
   0xf   :  { %399 = vmatpush.bf16.msra.mxu1 %v1346_v39  ;;  %v1636_v0 = vld [vmem:[%s2368_s1 + $0xfc] sm:$0xf]  ;;  %v1351_v1 = vld [vmem:[%s2368_s1 + $0x110] sm:$0xf0]  ;;  %v1298_v3 = vor.u32 %v1623_v58, %v1295_v59  ;;  %v1269_v4 = vld [vmem:[%s2368_s1 + $0x60] sm:$0xf]  ;;  %v1350_v8 = vor.u32 %v1639_v63, %v1349_v62 }
  0x10   :  { %v1620_v5 = vld [vmem:[%s2368_s1 + $0x74] sm:$0xf0]  ;;  %v1617_v6 = vld [vmem:[%s2368_s1 + $0x64] sm:$0xf]  ;;  %v1271_v7 = vld [vmem:[%s2368_s1 + $0x78] sm:$0xf0]  ;;  %v1354_v9 = vor.u32 %v1636_v0, %v1351_v1 }
  0x11   :  { %386 = vmatpush.bf16.msra.mxu0 %v1318_v53  ;;  %412 = vmatpush.bf16.msra.mxu2 %v1374_v60  ;;  %v1325_v10 = vld [vmem:[%s2368_s1 + $0xc8] sm:$0xf]  ;;  %v1633_v11 = vld [vmem:[%s2368_s1 + $0xdc] sm:$0xf0]  ;;  %v1630_v12 = vld [vmem:[%s2368_s1 + $0xcc] sm:$0xf] }
  0x12   :  { %54 = vrot.lane.b32.xlu0 %v51_v48, %s1761_s30  ;;  %70 = vrot.lane.b32.xlu2 %v67_v49, %s1762_s7  ;;  %v1327_v13 = vld [vmem:[%s2368_s1 + $0xe0] sm:$0xf0] }
  0x13   :  { %400 = vmatpush.bf16.msra.mxu1 %v1322_v54  ;;  %426 = vmatpush.bf16.msra.mxu3 %v1378_v61 }
  0x14   :  { %13 = vsyncpa [#allocation5], 0  ;;  %v1270_v14 = vor.u32 %v1620_v5, %v1269_v4  ;;  %v1274_v15 = vor.u32 %v1617_v6, %v1271_v7  ;;  %v1245_v16 = vld [vmem:[%s2368_s1 + $0x30] sm:$0xf]  ;;  %v1614_v17 = vld [vmem:[%s2368_s1 + $0x44] sm:$0xf0]  ;;  %v1326_v20 = vor.u32 %v1633_v11, %v1325_v10  ;;  %v1330_v21 = vor.u32 %v1630_v12, %v1327_v13 }
  0x15   :  { %387 = vmatpush.bf16.msra.mxu0 %v1294_v2  ;;  %413 = vmatpush.bf16.msra.mxu2 %v1350_v8  ;;  %v1611_v18 = vld [vmem:[%s2368_s1 + $0x34] sm:$0xf]  ;;  %v1247_v19 = vld [vmem:[%s2368_s1 + $0x48] sm:$0xf0]  ;;  %v1246_v22 = vor.u32 %v1614_v17, %v1245_v16  ;;  %v1221_v24 = vld [vmem:[%s2368_s1] sm:$0xf] }
  0x16   :  { %v1250_v23 = vor.u32 %v1611_v18, %v1247_v19  ;;  %v1608_v25 = vld [vmem:[%s2368_s1 + $0x14] sm:$0xf0]  ;;  %v1605_v26 = vld [vmem:[%s2368_s1 + $0x4] sm:$0xf]  ;;  %v1223_v27 = vld [vmem:[%s2368_s1 + $0x18] sm:$0xf0] }
  0x17   :  { %401 = vmatpush.bf16.msra.mxu1 %v1298_v3  ;;  %427 = vmatpush.bf16.msra.mxu3 %v1354_v9  ;;  %v1222_v28 = vor.u32 %v1608_v25, %v1221_v24  ;;  %v1226_v29 = vor.u32 %v1605_v26, %v1223_v27  ;;  %v1301_v30 = vld [vmem:[%s2368_s1 + $0x98] sm:$0xf]  ;;  %v1627_v31 = vld [vmem:[%s2368_s1 + $0xac] sm:$0xf0]  ;;  %v1624_v32 = vld [vmem:[%s2368_s1 + $0x9c] sm:$0xf] }
  0x18   :  { %v1302_v33 = vor.u32 %v1627_v31, %v1301_v30  ;;  %v1303_v34 = vld [vmem:[%s2368_s1 + $0xb0] sm:$0xf0]  ;;  %v1405_v35 = vld [vmem:[%s2368_s1 + $0x160] sm:$0xf]  ;;  %v1652_v36 = vld [vmem:[%s2368_s1 + $0x174] sm:$0xf0] }
  0x19   :  { %388 = vmatpush.bf16.msra.mxu0 %v1270_v14  ;;  %414 = vmatpush.bf16.msra.mxu2 %v1326_v20  ;;  %v1306_v37 = vor.u32 %v1624_v32, %v1303_v34  ;;  %v1406_v38 = vor.u32 %v1652_v36, %v1405_v35  ;;  %v1649_v39 = vld [vmem:[%s2368_s1 + $0x164] sm:$0xf]  ;;  %v1407_v40 = vld [vmem:[%s2368_s1 + $0x178] sm:$0xf0]  ;;  %v1277_v42 = vld [vmem:[%s2368_s1 + $0x68] sm:$0xf] }
  0x1a   :  { %v1410_v41 = vor.u32 %v1649_v39, %v1407_v40  ;;  %v1621_v43 = vld [vmem:[%s2368_s1 + $0x7c] sm:$0xf0]  ;;  %v1618_v45 = vld [vmem:[%s2368_s1 + $0x6c] sm:$0xf]  ;;  %v1279_v46 = vld [vmem:[%s2368_s1 + $0x80] sm:$0xf0] }
  0x1b   :  { %402 = vmatpush.bf16.msra.mxu1 %v1274_v15  ;;  %428 = vmatpush.bf16.msra.mxu3 %v1330_v21  ;;  %v1278_v44 = vor.u32 %v1621_v43, %v1277_v42  ;;  %v1381_v47 = vld [vmem:[%s2368_s1 + $0x130] sm:$0xf]  ;;  %v1282_v48 = vor.u32 %v1618_v45, %v1279_v46  ;;  %v1646_v49 = vld [vmem:[%s2368_s1 + $0x144] sm:$0xf0]  ;;  %v1643_v50 = vld [vmem:[%s2368_s1 + $0x134] sm:$0xf] }
  0x1c   :  { %v1383_v51 = vld [vmem:[%s2368_s1 + $0x148] sm:$0xf0]  ;;  %v1382_v52 = vor.u32 %v1646_v49, %v1381_v47  ;;  %v1253_v54 = vld [vmem:[%s2368_s1 + $0x38] sm:$0xf]  ;;  %v1615_v55 = vld [vmem:[%s2368_s1 + $0x4c] sm:$0xf0] }
  0x1d   :  { %389 = vmatpush.bf16.msra.mxu0 %v1246_v22  ;;  %415 = vmatpush.bf16.msra.mxu2 %v1302_v33  ;;  %v1386_v53 = vor.u32 %v1643_v50, %v1383_v51  ;;  %v1612_v56 = vld [vmem:[%s2368_s1 + $0x3c] sm:$0xf]  ;;  %v1254_v57 = vor.u32 %v1615_v55, %v1253_v54  ;;  %v1255_v58 = vld [vmem:[%s2368_s1 + $0x50] sm:$0xf0]  ;;  %v1357_v59 = vld [vmem:[%s2368_s1 + $0x100] sm:$0xf] }
  0x1e   :  { %v1640_v60 = vld [vmem:[%s2368_s1 + $0x114] sm:$0xf0]  ;;  %v1258_v61 = vor.u32 %v1612_v56, %v1255_v58  ;;  %v1637_v63 = vld [vmem:[%s2368_s1 + $0x104] sm:$0xf]  ;;  %v1359_v0 = vld [vmem:[%s2368_s1 + $0x118] sm:$0xf0] }
  0x1f   :  { %403 = vmatpush.bf16.msra.mxu1 %v1250_v23  ;;  %429 = vmatpush.bf16.msra.mxu3 %v1306_v37  ;;  %v1358_v62 = vor.u32 %v1640_v60, %v1357_v59  ;;  %v1362_v1 = vor.u32 %v1637_v63, %v1359_v0  ;;  %v1229_v2 = vld [vmem:[%s2368_s1 + $0x8] sm:$0xf]  ;;  %v1609_v3 = vld [vmem:[%s2368_s1 + $0x1c] sm:$0xf0]  ;;  %v1606_v4 = vld [vmem:[%s2368_s1 + $0xc] sm:$0xf] }
  0x20   :  { %v1230_v5 = vor.u32 %v1609_v3, %v1229_v2  ;;  %v1231_v6 = vld [vmem:[%s2368_s1 + $0x20] sm:$0xf0]  ;;  %v1333_v7 = vld [vmem:[%s2368_s1 + $0xd0] sm:$0xf]  ;;  %v1634_v8 = vld [vmem:[%s2368_s1 + $0xe4] sm:$0xf0] }
  0x21   :  { %390 = vmatpush.bf16.msra.mxu0 %v1222_v28  ;;  %416 = vmatpush.bf16.msra.mxu2 %v1278_v44  ;;  %v1234_v9 = vor.u32 %v1606_v4, %v1231_v6  ;;  %v1334_v10 = vor.u32 %v1634_v8, %v1333_v7  ;;  %v1631_v11 = vld [vmem:[%s2368_s1 + $0xd4] sm:$0xf]  ;;  %v1335_v12 = vld [vmem:[%s2368_s1 + $0xe8] sm:$0xf0]  ;;  %v1309_v14 = vld [vmem:[%s2368_s1 + $0xa0] sm:$0xf]  ;;  %v467_v7 = vlaneseq }
  0x22   :  { %v1338_v13 = vor.u32 %v1631_v11, %v1335_v12  ;;  %v1628_v15 = vld [vmem:[%s2368_s1 + $0xb4] sm:$0xf0]  ;;  %v1625_v16 = vld [vmem:[%s2368_s1 + $0xa4] sm:$0xf]  ;;  %v1311_v18 = vld [vmem:[%s2368_s1 + $0xb8] sm:$0xf0] }
  0x23   :  { %404 = vmatpush.bf16.msra.mxu1 %v1226_v29  ;;  %430 = vmatpush.bf16.msra.mxu3 %v1282_v48  ;;  %v1310_v17 = vor.u32 %v1628_v15, %v1309_v14  ;;  %v1314_v19 = vor.u32 %v1625_v16, %v1311_v18  ;;  %v1285_v20 = vld [vmem:[%s2368_s1 + $0x70] sm:$0xf]  ;;  %v1622_v21 = vld [vmem:[%s2368_s1 + $0x84] sm:$0xf0]  ;;  %v1619_v22 = vld [vmem:[%s2368_s1 + $0x74] sm:$0xf] }
  0x24   :  { %v1287_v23 = vld [vmem:[%s2368_s1 + $0x88] sm:$0xf0]  ;;  %v1286_v24 = vor.u32 %v1622_v21, %v1285_v20  ;;  %v1261_v26 = vld [vmem:[%s2368_s1 + $0x40] sm:$0xf]  ;;  %v1616_v27 = vld [vmem:[%s2368_s1 + $0x54] sm:$0xf0] }
  0x25   :  { %439 = vmatpush.bf16.msrb.mxu0 %v1406_v38  ;;  %417 = vmatpush.bf16.msra.mxu2 %v1254_v57  ;;  %v1290_v25 = vor.u32 %v1619_v22, %v1287_v23  ;;  %v1613_v28 = vld [vmem:[%s2368_s1 + $0x44] sm:$0xf]  ;;  %v1263_v29 = vld [vmem:[%s2368_s1 + $0x58] sm:$0xf0]  ;;  %v1262_v30 = vor.u32 %v1616_v27, %v1261_v26  ;;  %v1237_v32 = vld [vmem:[%s2368_s1 + $0x10] sm:$0xf] }
  0x26   :  { %v1266_v31 = vor.u32 %v1613_v28, %v1263_v29  ;;  %v1610_v33 = vld [vmem:[%s2368_s1 + $0x24] sm:$0xf0]  ;;  %v1607_v34 = vld [vmem:[%s2368_s1 + $0x14] sm:$0xf]  ;;  %v1239_v35 = vld [vmem:[%s2368_s1 + $0x28] sm:$0xf0] }
  0x27   :  { %453 = vmatpush.bf16.msrb.mxu1 %v1410_v41  ;;  %431 = vmatpush.bf16.msra.mxu3 %v1258_v61  ;;  %v1238_v36 = vor.u32 %v1610_v33, %v1237_v32  ;;  %v1242_v37 = vor.u32 %v1607_v34, %v1239_v35  ;;  %vm72_vm0 = vcmask 261120   ;;  %v24_v41 = vld [vmem:[%s2367_s0] sm:$0xf]  ;;  %v1660_v42 = vld [vmem:[%s2370_s3 + $0x38] sm:$0xff]  ;;  %v1659_v44 = vld [vmem:[%s2370_s3 + $0x30] sm:$0xff]  ;;  %vm79_vm1 = vcmask 523264  }
  0x28   :  { %v1668_v43 = vld [vmem:[%s2370_s3 + $0x78] sm:$0xff]  ;;  %v1667_v45 = vld [vmem:[%s2370_s3 + $0x70] sm:$0xff]  ;;  %vm84_vm2 = vcmask 785408   ;;  %v26_v48 = vld [vmem:[%s2367_s0 + $0x8] sm:$0xf]  ;;  %vm617_vm6 = vcmask 1041408  }
  0x29   :  { %440 = vmatpush.bf16.msrb.mxu0 %v1382_v52  ;;  %418 = vmatpush.bf16.msra.mxu2 %v1230_v5  ;;  %v1658_v59 = vld [vmem:[%s2370_s3 + $0x28] sm:$0xff]  ;;  %v1657_v61 = vld [vmem:[%s2370_s3 + $0x20] sm:$0xff]  ;;  %v1656_v63 = vld [vmem:[%s2370_s3 + $0x18] sm:$0xff]  ;;  %vm619_vm7 = vcmask 1045508   ;;  %vm633_vm8 = vcmask 1041409   ;;  %vm621_vm9 = vcmask 1043456  }
  0x2a   :  { %v1666_v60 = vld [vmem:[%s2370_s3 + $0x68] sm:$0xff]  ;;  %v1664_v0 = vld [vmem:[%s2370_s3 + $0x58] sm:$0xff]  ;;  %v1655_v3 = vld [vmem:[%s2370_s3 + $0x10] sm:$0xff]  ;;  %vm635_vm10 = vcmask 1043459   ;;  %vm637_vm11 = vcmask 1045509   ;;  %vm639_vm12 = vcmask 1047559  }
  0x2b   :  { %454 = vmatpush.bf16.msrb.mxu1 %v1386_v53  ;;  %432 = vmatpush.bf16.msra.mxu3 %v1234_v9  ;;  %v1684_v2 = vld [vmem:[%s2370_s3 + $0xf8] sm:$0xff]  ;;  %v1663_v4 = vld [vmem:[%s2370_s3 + $0x50] sm:$0xff]  ;;  %v1654_v8 = vld [vmem:[%s2370_s3 + $0x8] sm:$0xff]  ;;  %s1186_s1 = sshll.u32 %s2372_s5, 4  ;;  %s1187_s1 = int_to_ptr.hbm [resolvable:$true] %s1186_s1 }
  0x2c   :  { %v1675_v5 = vld [vmem:[%s2370_s3 + $0xb0] sm:$0xff]  ;;  %v1662_v9 = vld [vmem:[%s2370_s3 + $0x48] sm:$0xff]  ;;  %v1661_v14 = vld [vmem:[%s2370_s3 + $0x40] sm:$0xff] }
  0x2d   :  { %441 = vmatpush.bf16.msrb.mxu0 %v1358_v62  ;;  %1100 = vmatpush.bf16.msrb.mxu2 %v1660_v42  ;;  %v1665_v62 = vld [vmem:[%s2370_s3 + $0x60] sm:$0xff]  ;;  %v1683_v6 = vld [vmem:[%s2370_s3 + $0xf0] sm:$0xff]  ;;  %v1674_v11 = vld [vmem:[%s2370_s3 + $0xa8] sm:$0xff] }
  0x2e   :  { %v1682_v12 = vld [vmem:[%s2370_s3 + $0xe8] sm:$0xff]  ;;  %v1692_v15 = vld [vmem:[%s2370_s3 + $0x138] sm:$0xff]  ;;  %v1681_v18 = vld [vmem:[%s2370_s3 + $0xe0] sm:$0xff] }
  0x2f   :  { %455 = vmatpush.bf16.msrb.mxu1 %v1362_v1  ;;  %1113 = vmatpush.bf16.msrb.mxu3 %v1668_v43  ;;  %v1676_v1 = vld [vmem:[%s2370_s3 + $0xb8] sm:$0xff]  ;;  %v1691_v21 = vld [vmem:[%s2370_s3 + $0x130] sm:$0xff]  ;;  %v1690_v29 = vld [vmem:[%s2370_s3 + $0x128] sm:$0xff] }
  0x30   :  { %v1700_v16 = vld [vmem:[%s2370_s3 + $0x178] sm:$0xff]  ;;  %v1699_v22 = vld [vmem:[%s2370_s3 + $0x170] sm:$0xff] }
  0x31   :  { %442 = vmatpush.bf16.msrb.mxu0 %v1334_v10  ;;  %1101 = vmatpush.bf16.msrb.mxu2 %v1659_v44  ;;  %v2169_v10 = vshrl.u32 %v467_v7, 7  ;;  %v1680_v26 = vld [vmem:[%s2370_s3 + $0xd8] sm:$0xff]  ;;  %v1671_v33 = vld [vmem:[%s2370_s3 + $0x90] sm:$0xff] }
  0x32   :  { %v1679_v34 = vld [vmem:[%s2370_s3 + $0xd0] sm:$0xff] }
  0x33   :  { %456 = vmatpush.bf16.msrb.mxu1 %v1338_v13  ;;  %1114 = vmatpush.bf16.msrb.mxu3 %v1667_v45  ;;  %v1653_v13 = vld [vmem:[%s2370_s3] sm:$0xff]  ;;  %vm469_vm3 = vcmp.lt.s32.totalorder %v2169_v10, 7  ;;  %vm471_vm4 = vcmp.lt.s32.totalorder %v2169_v10, 6  ;;  %vm473_vm5 = vcmp.lt.s32.totalorder %v2169_v10, 5 }
  0x35   :  { %443 = vmatpush.bf16.msrb.mxu0 %v1310_v17  ;;  %1102 = vmatpush.bf16.msrb.mxu2 %v1658_v59  ;;  %v1673_v17 = vld [vmem:[%s2370_s3 + $0xa0] sm:$0xff] }
  0x37   :  { %457 = vmatpush.bf16.msrb.mxu1 %v1314_v19  ;;  %1115 = vmatpush.bf16.msrb.mxu3 %v1666_v60  ;;  %v1763_v19 = vmov -inf  }
  0x38   :  { %v470_v20 = vsel %vm469_vm3, 0.0, %v1763_v19 }
  0x39   :  { %444 = vmatpush.bf16.msrb.mxu0 %v1286_v24  ;;  %1103 = vmatpush.bf16.msrb.mxu2 %v1657_v61 }
  0x3b   :  { %458 = vmatpush.bf16.msrb.mxu1 %v1290_v25  ;;  %1116 = vmatpush.bf16.msrb.mxu3 %v1665_v62  ;;  %v1672_v25 = vld [vmem:[%s2370_s3 + $0x98] sm:$0xff] }
  0x3d   :  { %445 = vmatpush.bf16.msrb.mxu0 %v1262_v30  ;;  %1104 = vmatpush.bf16.msrb.mxu2 %v1656_v63  ;;  %v1698_v30 = vld [vmem:[%s2370_s3 + $0x168] sm:$0xff] }
  0x3f   :  { %459 = vmatpush.bf16.msrb.mxu1 %v1266_v31  ;;  %1117 = vmatpush.bf16.msrb.mxu3 %v1664_v0 }
  0x41   :  { %446 = vmatpush.bf16.msrb.mxu0 %v1238_v36  ;;  %1105 = vmatpush.bf16.msrb.mxu2 %v1655_v3  ;;  %v2225_v36 = vld [vmem:[%s2369_s2] sm:$0x3f]  ;;  %s1197_s2 = sshll.u32 %s2373_s6, 4  ;;  %s1765_s6 = smov [#allocation2]   ;;  %s1198_s2 = int_to_ptr.hbm [resolvable:$true] %s1197_s2 }
  0x42   :  { %v561_v45 = vperm.slane %v2225_v36, 0  ;;  %v564_v10 = vperm.slane %v2225_v36, 3  ;;  %s1184_s12 = sshll.u32 %s1765_s6, 4  ;;  %s1185_s12 = int_to_ptr.vmem [resolvable:$true] %s1184_s12 }
  0x43   :  { %460 = vmatpush.bf16.msrb.mxu1 %v1242_v37  ;;  %1118 = vmatpush.bf16.msrb.mxu3 %v1663_v4 }
  0x45   :  { %1106 = vmatpush.bf16.msrb.mxu2 %v1654_v8  ;;  %v2247_v8 = vsel %vm473_vm5, 0.0, %v1763_v19 }
  0x47   :  { %1119 = vmatpush.bf16.msrb.mxu3 %v1662_v9 }
  0x49   :  { %1107 = vmatpush.bf16.msrb.mxu2 %v1653_v13 }
  0x4b   :  { %1120 = vmatpush.bf16.msrb.mxu3 %v1661_v14 }
  0x64   :  { %v69_v39 = vpop.permute.xlu2 %68 }
  0x6c   :  { %v71_v51 = vpop.permute.xlu2 %70 }
  0x78   :  { %v59_v38 = vpop.permute.xlu1 %58 }
  0x7c   :  { %v53_v40 = vpop.permute.xlu0 %52 }
  0x7d   :  { %v75_v46 = vsel %vm72_vm0, %v24_v41, %v53_v40  ;;  %v1697_v40 = vld [vmem:[%s2370_s3 + $0x160] sm:$0xff] }
  0x7e   :  { %v81_v47 = vsel %vm79_vm1, %v75_v46, %v59_v38  ;;  %v472_v38 = vsel %vm471_vm4, 0.0, %v1763_v19 }
  0x7f   :  { %v86_v52 = vsel %vm84_vm2, %v81_v47, %v69_v39  ;;  %v1689_v39 = vld [vmem:[%s2370_s3 + $0x120] sm:$0xff] }
  0x80   :  { %v61_v49 = vpop.permute.xlu1 %60  ;;  %v139_v56 = vunpack.c.l.b16 %v86_v52 }
  0x84   :  { %v55_v50 = vpop.permute.xlu0 %54 }
  0x85   :  { %v78_v53 = vsel %vm72_vm0, %v26_v48, %v55_v50  ;;  %v1670_v50 = vld [vmem:[%s2370_s3 + $0x88] sm:$0xff] }
  0x86   :  { %v83_v54 = vsel %vm79_vm1, %v78_v53, %v61_v49 }
  0x87   :  { %v88_v55 = vsel %vm84_vm2, %v83_v54, %v71_v51  ;;  %v1678_v51 = vld [vmem:[%s2370_s3 + $0xc8] sm:$0xff] }
  0x88   :  { %v140_v57 = vunpack.c.l.b16 %v88_v55 }
  0x8a   :  { %v141_v58 = vpack.c.b16 %v140_v57, %v139_v56  ;;  %v562_v56 = vperm.slane %v2225_v36, 1 }
  0x8c   :  { %391 = vmatmul.bf16.vlgmr.msra.gmra.mxu0 %v141_v58  ;;  %405 = vmatmul.bf16.vlgmr.msra.gmra.mxu1 %v141_v58 }
  0x8d   :  { %419 = vmatmul.bf16.vlgmr.msra.gmra.mxu2 %v141_v58  ;;  %433 = vmatmul.bf16.vlgmr.msra.gmra.mxu3 %v141_v58 }
  0x8e   :  { %1126 = vmatpush.bf16.msra.mxu0 %v1676_v1  ;;  %1139 = vmatpush.bf16.msra.mxu1 %v1684_v2 }
  0x8f   :  { %1152 = vmatpush.bf16.msra.mxu2 %v1692_v15  ;;  %1165 = vmatpush.bf16.msra.mxu3 %v1700_v16 }
  0x92   :  { %1127 = vmatpush.bf16.msra.mxu0 %v1675_v5  ;;  %1140 = vmatpush.bf16.msra.mxu1 %v1683_v6  ;;  %v563_v6 = vperm.slane %v2225_v36, 2 }
  0x93   :  { %1153 = vmatpush.bf16.msra.mxu2 %v1691_v21  ;;  %1166 = vmatpush.bf16.msra.mxu3 %v1699_v22 }
  0x96   :  { %1128 = vmatpush.bf16.msra.mxu0 %v1674_v11  ;;  %1141 = vmatpush.bf16.msra.mxu1 %v1682_v12 }
  0x97   :  { %1154 = vmatpush.bf16.msra.mxu2 %v1690_v29  ;;  %1167 = vmatpush.bf16.msra.mxu3 %v1698_v30 }
  0x9a   :  { %1129 = vmatpush.bf16.msra.mxu0 %v1673_v17  ;;  %1142 = vmatpush.bf16.msra.mxu1 %v1681_v18 }
  0x9b   :  { %1155 = vmatpush.bf16.msra.mxu2 %v1689_v39  ;;  %1168 = vmatpush.bf16.msra.mxu3 %v1697_v40  ;;  %v1696_v39 = vld [vmem:[%s2370_s3 + $0x158] sm:$0xff]  ;;  %v1669_v40 = vld [vmem:[%s2370_s3 + $0x80] sm:$0xff] }
  0x9c   :  { %447 = vmatmul.bf16.vlgmr.msrb.gmra.mxu0 %v141_v58  ;;  %461 = vmatmul.bf16.vlgmr.msrb.gmra.mxu1 %v141_v58 }
  0x9e   :  { %1130 = vmatpush.bf16.msra.mxu0 %v1672_v25  ;;  %1143 = vmatpush.bf16.msra.mxu1 %v1680_v26 }
  0x9f   :  { %1169 = vmatpush.bf16.msra.mxu3 %v1696_v39 }
  0xa2   :  { %1131 = vmatpush.bf16.msra.mxu0 %v1671_v33  ;;  %1144 = vmatpush.bf16.msra.mxu1 %v1679_v34 }
  0xa6   :  { %1132 = vmatpush.bf16.msra.mxu0 %v1670_v50  ;;  %1145 = vmatpush.bf16.msra.mxu1 %v1678_v51  ;;  %v1687_v51 = vld [vmem:[%s2370_s3 + $0x110] sm:$0xff] }
  0xaa   :  { %1133 = vmatpush.bf16.msra.mxu0 %v1669_v40 }
 0x109   :  { %v392_v23 = vpop.f32.mrf.mxu0  ;;  %v406_v24 = vpop.f32.mrf.mxu1 }
 0x10a   :  { %v475_v27 = vadd.f32 %v470_v20, %v392_v23  ;;  %v476_v28 = vadd.f32 %v470_v20, %v406_v24 }
 0x10c   :  { %v487_v31 = vrot.slane %v475_v27, 4  ;;  %v493_v32 = vrot.slane %v476_v28, 4 }
 0x10e   :  { %v488_v35 = vmax.f32 %v475_v27, %v487_v31  ;;  %v494_v37 = vmax.f32 %v476_v28, %v493_v32 }
 0x110   :  { %v489_v41 = vrot.slane %v488_v35, 2  ;;  %v495_v42 = vrot.slane %v494_v37, 2  ;;  %v420_v43 = vpop.f32.mrf.mxu2  ;;  %v434_v44 = vpop.f32.mrf.mxu3 }
 0x111   :  { %v477_v46 = vadd.f32 %v472_v38, %v420_v43  ;;  %v478_v47 = vadd.f32 %v472_v38, %v434_v44  ;;  %v394_v48 = vpop.f32.mrf.mxu0  ;;  %v408_v49 = vpop.f32.mrf.mxu1 }
 0x112   :  { %v490_v52 = vmax.f32 %v488_v35, %v489_v41  ;;  %v496_v53 = vmax.f32 %v494_v37, %v495_v42  ;;  %v481_v54 = vadd.f32 %v470_v20, %v394_v48  ;;  %v482_v55 = vadd.f32 %v470_v20, %v408_v49 }
 0x113   :  { %v499_v57 = vrot.slane %v477_v46, 4  ;;  %v505_v58 = vrot.slane %v478_v47, 4 }
 0x114   :  { %v491_v59 = vrot.slane %v490_v52, 1  ;;  %v497_v60 = vrot.slane %v496_v53, 1  ;;  %v523_v61 = vrot.slane %v481_v54, 4  ;;  %v529_v62 = vrot.slane %v482_v55, 4 }
 0x115   :  { %v500_v63 = vmax.f32 %v477_v46, %v499_v57  ;;  %v506_v0 = vmax.f32 %v478_v47, %v505_v58  ;;  %v1677_v46 = vld [vmem:[%s2370_s3 + $0xc0] sm:$0xff] }
 0x116   :  { %v492_v1 = vmax.f32 %v490_v52, %v491_v59  ;;  %v498_v2 = vmax.f32 %v496_v53, %v497_v60  ;;  %v524_v3 = vmax.f32 %v481_v54, %v523_v61  ;;  %v530_v4 = vmax.f32 %v482_v55, %v529_v62  ;;  %v1695_v52 = vld [vmem:[%s2370_s3 + $0x150] sm:$0xff]  ;;  %1146 = vmatpush.bf16.msra.mxu1 %v1677_v46 }
 0x117   :  { %v501_v5 = vrot.slane %v500_v63, 2  ;;  %v507_v7 = vrot.slane %v506_v0, 2  ;;  %1170 = vmatpush.bf16.msra.mxu3 %v1695_v52 }
 0x118   :  { %v573_v9 = vadd.f32 %v561_v45, %v492_v1  ;;  %v574_v11 = vadd.f32 %v562_v56, %v498_v2  ;;  %v525_v12 = vrot.slane %v524_v3, 2  ;;  %v531_v13 = vrot.slane %v530_v4, 2  ;;  %v422_v14 = vpop.f32.mrf.mxu2  ;;  %v436_v15 = vpop.f32.mrf.mxu3  ;;  %v1686_v2 = vld [vmem:[%s2370_s3 + $0x108] sm:$0xff] }
 0x119   :  { %v502_v16 = vmax.f32 %v500_v63, %v501_v5  ;;  %v508_v17 = vmax.f32 %v506_v0, %v507_v7  ;;  %v483_v18 = vadd.f32 %v472_v38, %v422_v14  ;;  %v484_v20 = vadd.f32 %v472_v38, %v436_v15  ;;  %v448_v21 = vpop.f32.mrf.mxu0  ;;  %v462_v24 = vpop.f32.mrf.mxu1  ;;  %v1688_v38 = vld [vmem:[%s2370_s3 + $0x118] sm:$0xff] }
 0x11a   :  { %v2253_v22 = vmax.f32 %v574_v11, 0.0  ;;  %v526_v19 = vmax.f32 %v524_v3, %v525_v12  ;;  %v532_v23 = vmax.f32 %v530_v4, %v531_v13  ;;  %v2256_v29 = vmax.f32 %v573_v9, 0.0  ;;  %1156 = vmatpush.bf16.msra.mxu2 %v1688_v38  ;;  %v1694_v3 = vld [vmem:[%s2370_s3 + $0x148] sm:$0xff] }
 0x11b   :  { %v503_v25 = vrot.slane %v502_v16, 1  ;;  %v509_v26 = vrot.slane %v508_v17, 1  ;;  %v535_v27 = vrot.slane %v483_v18, 4  ;;  %v541_v28 = vrot.slane %v484_v20, 4  ;;  %1171 = vmatpush.bf16.msra.mxu3 %v1694_v3 }
 0x11c   :  { %v527_v30 = vrot.slane %v526_v19, 1  ;;  %v533_v31 = vrot.slane %v532_v23, 1  ;;  %v479_v32 = vadd.f32 %v2247_v8, %v448_v21  ;;  %v609_v41 = vrot.slane %v2253_v22, 6 }
 0x11d   :  { %v504_v33 = vmax.f32 %v502_v16, %v503_v25  ;;  %v510_v34 = vmax.f32 %v508_v17, %v509_v26  ;;  %v536_v35 = vmax.f32 %v483_v18, %v535_v27  ;;  %v542_v37 = vmax.f32 %v484_v20, %v541_v28  ;;  %v1685_v26 = vld [vmem:[%s2370_s3 + $0x100] sm:$0xff] }
 0x11e   :  { %v528_v42 = vmax.f32 %v526_v19, %v527_v30  ;;  %v534_v43 = vmax.f32 %v532_v23, %v533_v31  ;;  %v511_v44 = vrot.slane %v479_v32, 4  ;;  %v480_v57 = vadd.f32 %v2247_v8, %v462_v24  ;;  %1157 = vmatpush.bf16.msra.mxu2 %v1687_v51  ;;  %v1693_v27 = vld [vmem:[%s2370_s3 + $0x140] sm:$0xff]  ;;  %s1764_s3 = smov [#allocation4]  }
 0x11f   :  { %v575_v47 = vadd.f32 %v563_v6, %v504_v33  ;;  %v576_v48 = vadd.f32 %v564_v10, %v510_v34  ;;  %v537_v49 = vrot.slane %v536_v35, 2  ;;  %v543_v50 = vrot.slane %v542_v37, 2  ;;  %1172 = vmatpush.bf16.msra.mxu3 %v1693_v27  ;;  %s1195_s15 = sshll.u32 %s1764_s3, 4  ;;  %s1196_s15 = int_to_ptr.vmem [resolvable:$true] %s1195_s15 }
 0x120   :  { %v579_v53 = vadd.f32 %v561_v45, %v528_v42  ;;  %v580_v54 = vadd.f32 %v562_v56, %v534_v43  ;;  %v512_v55 = vmax.f32 %v479_v32, %v511_v44  ;;  %v517_v63 = vrot.slane %v480_v57, 4 }
 0x121   :  { %v587_v58 = vmax.f32 %v575_v47, 0.0  ;;  %v2287_v59 = vmax.f32 %v576_v48, 0.0  ;;  %v538_v60 = vmax.f32 %v536_v35, %v537_v49  ;;  %v544_v61 = vmax.f32 %v542_v37, %v543_v50  ;;  %v450_v11 = vpop.f32.mrf.mxu0  ;;  %v464_v12 = vpop.f32.mrf.mxu1 }
 0x122   :  { %v513_v62 = vrot.slane %v512_v55, 2  ;;  %v2291_v0 = vsel %vm617_vm6, %v2256_v29, %v609_v41  ;;  %v2293_v45 = vmax.f32 %v579_v53, 0.0  ;;  %v565_v56 = vperm.slane %v2225_v36, 4  ;;  %1158 = vmatpush.bf16.msra.mxu2 %v1686_v2 }
 0x123   :  { %v566_v1 = vperm.slane %v2225_v36, 5  ;;  %v2303_v4 = vmax.f32 %v580_v54, 0.0  ;;  %v539_v5 = vrot.slane %v538_v60, 1  ;;  %v545_v7 = vrot.slane %v544_v61, 1 }
 0x124   :  { %v514_v9 = vmax.f32 %v512_v55, %v513_v62  ;;  %v610_v13 = vrot.slane %v587_v58, 4  ;;  %v654_v14 = vpack.c.bf16 %v587_v58, %v587_v58  ;;  %v611_v15 = vrot.slane %v2287_v59, 2 }
 0x125   :  { %v518_v16 = vmax.f32 %v480_v57, %v517_v63  ;;  %v655_v17 = vpack.c.bf16 %v2287_v59, %v2287_v59  ;;  %v540_v18 = vmax.f32 %v538_v60, %v539_v5  ;;  %v546_v20 = vmax.f32 %v544_v61, %v545_v7 }
 0x126   :  { %v515_v21 = vrot.slane %v514_v9, 1  ;;  %v485_v23 = vadd.f32 %v2247_v8, %v450_v11  ;;  %v486_v24 = vadd.f32 %v2247_v8, %v464_v12  ;;  %v652_v25 = vpack.c.bf16 %v2256_v29, %v2256_v29  ;;  %1159 = vmatpush.bf16.msra.mxu2 %v1685_v26 }
 0x127   :  { %v519_v19 = vrot.slane %v518_v16, 2  ;;  %v581_v28 = vadd.f32 %v563_v6, %v540_v18  ;;  %v582_v30 = vadd.f32 %v564_v10, %v546_v20  ;;  %v658_v29 = vpack.c.bf16 %v2293_v45, %v2293_v45 }
 0x128   :  { %v516_v8 = vmax.f32 %v514_v9, %v515_v21  ;;  %v613_v31 = vrot.slane %v2303_v4, 6  ;;  %v547_v33 = vrot.slane %v485_v23, 4  ;;  %v553_v34 = vrot.slane %v486_v24, 4 }
 0x129   :  { %v520_v32 = vmax.f32 %v518_v16, %v519_v19  ;;  %v778_v35 = vunpack.c.l.b16 %v654_v14  ;;  %v593_v37 = vmax.f32 %v581_v28, 0.0  ;;  %v594_v38 = vmax.f32 %v582_v30, 0.0 }
 0x12a   :  { %v782_v39 = vunpack.c.l.b16 %v658_v29  ;;  %v620_v40 = vsel %vm619_vm7, %v610_v13, %v611_v15  ;;  %v548_v6 = vmax.f32 %v485_v23, %v547_v33  ;;  %v554_v42 = vmax.f32 %v486_v24, %v553_v34 }
 0x12b   :  { %v521_v41 = vrot.slane %v520_v32, 1  ;;  %v660_v10 = vpack.c.bf16 %v593_v37, %v593_v37  ;;  %v661_v43 = vpack.c.bf16 %v594_v38, %v594_v38  ;;  %v577_v44 = vadd.f32 %v565_v56, %v516_v8 }
 0x12c   :  { %v776_v46 = vunpack.c.l.b16 %v652_v25  ;;  %v549_v48 = vrot.slane %v548_v6, 2  ;;  %v555_v49 = vrot.slane %v554_v42, 2  ;;  %v653_v50 = vpack.c.bf16 %v2253_v22, %v2253_v22 }
 0x12d   :  { %v522_v47 = vmax.f32 %v520_v32, %v521_v41  ;;  %v614_v51 = vrot.slane %v593_v37, 4  ;;  %v784_v52 = vunpack.c.l.b16 %v660_v10  ;;  %v785_v53 = vunpack.c.l.b16 %v661_v43 }
 0x12e   :  { %v788_v54 = vrot.slane %v782_v39, 7  ;;  %v615_v55 = vrot.slane %v594_v38, 2  ;;  %v550_v58 = vmax.f32 %v548_v6, %v549_v48  ;;  %v556_v59 = vmax.f32 %v554_v42, %v555_v49 }
 0x12f   :  { %v578_v57 = vadd.f32 %v566_v1, %v522_v47  ;;  %v792_v60 = vrot.slane %v784_v52, 7  ;;  %v794_v61 = vrot.slane %v785_v53, 7  ;;  %v659_v63 = vpack.c.bf16 %v2303_v4, %v2303_v4 }
 0x130   :  { %v789_v62 = vsel %vm633_vm8, %v788_v54, %v776_v46  ;;  %v779_v2 = vunpack.c.l.b16 %v655_v17  ;;  %v589_v3 = vmax.f32 %v577_v44, 0.0  ;;  %v551_v22 = vrot.slane %v550_v58, 1  ;;  %v1707_v54 = vld [vmem:[%s2371_s4] ss:$0 sm:$0xff] }
 0x131   :  { %v557_v5 = vrot.slane %v556_v59, 1  ;;  %v590_v7 = vmax.f32 %v578_v57, 0.0  ;;  %v800_v9 = vpack.c.b16 %v789_v62, %v789_v62  ;;  %v783_v11 = vunpack.c.l.b16 %v659_v63 }
 0x132   :  { %v793_v12 = vsel %vm633_vm8, %v792_v60, %v778_v35  ;;  %v624_v13 = vsel %vm617_vm6, %v2293_v45, %v613_v31  ;;  %v625_v14 = vsel %vm619_vm7, %v614_v51, %v615_v55  ;;  %v552_v15 = vmax.f32 %v550_v58, %v551_v22 }
 0x133   :  { %v558_v16 = vmax.f32 %v556_v59, %v557_v5  ;;  %1108 = vmatmul.bf16.vlgmr.msrb.gmra.mxu2 %v800_v9  ;;  %v777_v18 = vunpack.c.l.b16 %v653_v50  ;;  %v790_v20 = vrot.slane %v783_v11, 7  ;;  %v802_v4 = vpack.c.b16 %v793_v12, %v793_v12 }
 0x134   :  { %v795_v17 = vsel %vm633_vm8, %v794_v61, %v779_v2  ;;  %v583_v21 = vadd.f32 %v565_v56, %v552_v15  ;;  %v656_v24 = vpack.c.bf16 %v589_v3, %v589_v3  ;;  %v612_v45 = vrot.slane %v590_v7, 6 }
 0x135   :  { %v584_v19 = vadd.f32 %v566_v1, %v558_v16  ;;  %v803_v23 = vpack.c.b16 %v795_v17, %v795_v17  ;;  %v791_v25 = vsel %vm633_vm8, %v790_v20, %v777_v18  ;;  %1134 = vmatmul.bf16.vlgmr.msra.gmra.mxu0 %v802_v4  ;;  %v626_v26 = vsel %vm621_vm9, %v624_v13, %v625_v14 }
 0x136   :  { %v595_v27 = vmax.f32 %v583_v21, 0.0  ;;  %v801_v30 = vpack.c.b16 %v791_v25, %v791_v25  ;;  %v632_v8 = vrot.slane %v626_v26, 7  ;;  %v622_v29 = vsel %vm621_vm9, %v2291_v0, %v620_v40 }
 0x137   :  { %v596_v28 = vmax.f32 %v584_v19, 0.0  ;;  %1147 = vmatmul.bf16.vlgmr.msra.gmra.mxu1 %v803_v23  ;;  %v657_v38 = vpack.c.bf16 %v590_v7, %v590_v7  ;;  %v780_v40 = vunpack.c.l.b16 %v656_v24  ;;  %v623_v6 = vsel %vm617_vm6, %v589_v3, %v612_v45 }
 0x138   :  { %v662_v36 = vpack.c.bf16 %v595_v27, %v595_v27  ;;  %1121 = vmatmul.bf16.vlgmr.msrb.gmra.mxu3 %v801_v30  ;;  %v634_v31 = vsel %vm633_vm8, %v632_v8, %v622_v29 }
 0x139   :  { %v616_v56 = vrot.slane %v596_v28, 6  ;;  %v663_v1 = vpack.c.bf16 %v596_v28, %v596_v28  ;;  %v636_v32 = vsel %vm635_vm10, %v632_v8, %v634_v31  ;;  %v781_v46 = vunpack.c.l.b16 %v657_v38 }
 0x13a   :  { %v786_v33 = vunpack.c.l.b16 %v662_v36  ;;  %v638_v37 = vsel %vm637_vm11, %v632_v8, %v636_v32 }
 0x13b   :  { %v787_v34 = vunpack.c.l.b16 %v663_v1  ;;  %v627_v35 = vsel %vm617_vm6, %v595_v27, %v616_v56  ;;  %v640_v0 = vsel %vm639_vm12, %v632_v8, %v638_v37 }
 0x13c   :  { %v643_v39 = vrot.slane %v627_v35, 7  ;;  %v796_v41 = vrot.slane %v786_v33, 7  ;;  %650 = vst [vmem:[#allocation4] sm:$0xff] %v640_v0 }
 0x13d   :  { %v798_v42 = vrot.slane %v787_v34, 7 }
 0x13e   :  { %v644_v10 = vsel %vm633_vm8, %v643_v39, %v623_v6  ;;  %v797_v43 = vsel %vm633_vm8, %v796_v41, %v780_v40 }
 0x13f   :  { %v645_v44 = vsel %vm635_vm10, %v643_v39, %v644_v10  ;;  %v804_v47 = vpack.c.b16 %v797_v43, %v797_v43  ;;  %v799_v50 = vsel %vm633_vm8, %v798_v42, %v781_v46 }
 0x140   :  { %v646_v48 = vsel %vm637_vm11, %v643_v39, %v645_v44  ;;  %v805_v51 = vpack.c.b16 %v799_v50, %v799_v50 }
 0x141   :  { %v647_v49 = vsel %vm639_vm12, %v643_v39, %v646_v48 }
 0x142   :  { %651 = vst [vmem:[#allocation4 + $0x8] sm:$0xf] %v647_v49 }
 0x143   :  { %1160 = vmatmul.bf16.vlgmr.msra.gmra.mxu2 %v804_v47  ;;  %1200 = dma.vmem_to_hbm [thread:$0]  %s1196_s15, 192, %s1198_s2, [#allocation5]  }
 0x148   :  { %1173 = vmatmul.bf16.vlgmr.msra.gmra.mxu3 %v805_v51 }
 0x1b2   :  { %v1135_v52 = vpop.f32.mrf.mxu0 }
 0x1b4   :  { %v1148_v53 = vpop.f32.mrf.mxu1 }
 0x1b6   :  { %v1109_v55 = vpop.f32.mrf.mxu2 }
 0x1b7   :  { %v1110_v57 = vadd.f32 %v1707_v54, %v1109_v55 }
 0x1ba   :  { %v1137_v58 = vpop.f32.mrf.mxu0 }
 0x1bb   :  { %v1122_v59 = vpop.f32.mrf.mxu3 }
 0x1bc   :  { %v1150_v60 = vpop.f32.mrf.mxu1  ;;  %v1123_v61 = vadd.f32 %v1122_v59, %v1110_v57 }
 0x1be   :  { %v1111_v62 = vpop.f32.mrf.mxu2  ;;  %v1136_v63 = vadd.f32 %v1135_v52, %v1123_v61 }
 0x1c0   :  { %v1149_v3 = vadd.f32 %v1148_v53, %v1136_v63 }
 0x1c3   :  { %v1124_v2 = vpop.f32.mrf.mxu3 }
 0x1c6   :  { %v1161_v22 = vpop.f32.mrf.mxu2 }
 0x1c7   :  { %v1162_v5 = vadd.f32 %v1161_v22, %v1149_v3 }
 0x1cb   :  { %v1174_v7 = vpop.f32.mrf.mxu3 }
 0x1cc   :  { %v1175_v9 = vadd.f32 %v1174_v7, %v1162_v5 }
 0x1ce   :  { %1178 = vst [vmem:[#allocation2] sm:$0x3] %v1175_v9  ;;  %v1163_v11 = vpop.f32.mrf.mxu2 }
 0x1cf   :  { %1189 = dma.vmem_to_hbm [thread:$0]  %s1185_s12, 32, %s1187_s1, [#allocation3]  }
 0x1d3   :  { %v1176_v12 = vpop.f32.mrf.mxu3 }
 0x1d4   :  { %1756 = dma.done.wait [#allocation3], 32  }
 0x1d5   :  { %1757 = vsyncadd [#allocation3], 4294967264 }
 0x1d6   :  { %1758 = dma.done.wait [#allocation5], 192  }
 0x1d7   :  { %1759 = vsyncadd [#allocation5], 4294967104 }
 0x1d8   :  { %1209 = vsyncpa [#allocation3], 1 }
 0x1d9   :  { %1210 = vsyncpa [#allocation5], 1 }

</bundles_post_ra>
